<compile_context>
chip_gen: v5e
topology: v5e:2x2
jax: 0.10.0
libtpu: 0.0.40
codegen_flags: <defaults>
</compile_context>

<pallas_src>
import functools

import jax
import jax.numpy as jnp
from jax.experimental import pallas as pl
from jax.experimental.pallas import tpu as pltpu

LANE = 128
SUBLANE = 8
OUT_FEATURES = 784          # 28 * 28
OUT_PADDED = 896            # 7 * 128, lane-aligned


def _round_up(x, m):
    return (x + m - 1) // m * m


def generation_net_kernel(z_ref, w1_ref, b1_ref, w2_ref, b2_ref, w3_ref, b3_ref,
                          o_ref):
    """Fused 3-layer MLP: relu(fc1) -> relu(fc2) -> sigmoid(fc3).

    Weights may be f32 or bf16; activations are cast to the weight dtype only
    for the MXU operands.  Bias add / ReLU / sigmoid stay in f32.
    """
    w_dtype = w1_ref.dtype
    z = z_ref[...].astype(w_dtype)

    # fc1 + ReLU  (f32 accumulation on the MXU)
    h1 = jnp.dot(z, w1_ref[...], preferred_element_type=jnp.float32) + b1_ref[...]
    h1 = jnp.maximum(h1, 0.0)

    # fc2 + ReLU
    h2 = jnp.dot(h1.astype(w_dtype), w2_ref[...],
                 preferred_element_type=jnp.float32) + b2_ref[...]
    h2 = jnp.maximum(h2, 0.0)

    # fc3 + sigmoid (padded output columns hold sigmoid(0); sliced off outside)
    logits = jnp.dot(h2.astype(w_dtype), w3_ref[...],
                     preferred_element_type=jnp.float32) + b3_ref[...]
    o_ref[...] = jax.nn.sigmoid(logits)


def prepare_params(params, weight_dtype=jnp.float32):
    """One-time param prep: transpose to (in, out), zero-pad to lane-aligned
    shapes, optionally cast weights to bf16.  Call once, reuse every forward."""
    w1, b1, w2, b2, w3, b3 = params
    z_dim = w1.shape[1]
    h1_pad = _round_up(w1.shape[0], LANE)
    h2_pad = _round_up(w2.shape[0], LANE)

    def pad2(a, rows, cols):
        return jnp.pad(a, ((0, rows - a.shape[0]), (0, cols - a.shape[1])))

    w1t = pad2(w1.T.astype(weight_dtype), z_dim, h1_pad)        # (z_dim, h1_pad)
    w2t = pad2(w2.T.astype(weight_dtype), h1_pad, h2_pad)       # (h1_pad, h2_pad)
    w3t = pad2(w3.T.astype(weight_dtype), h2_pad, OUT_PADDED)   # (h2_pad, 896)
    b1r = pad2(b1.reshape(1, -1).astype(jnp.float32), 1, h1_pad)
    b2r = pad2(b2.reshape(1, -1).astype(jnp.float32), 1, h2_pad)
    b3r = pad2(b3.reshape(1, -1).astype(jnp.float32), 1, OUT_PADDED)
    return (w1t, b1r, w2t, b2r, w3t, b3r)


@functools.partial(jax.jit, static_argnames=("block_m",))
def generation_net_forward(z, prepared, block_m=128):
    """Runs the fused kernel over a 1-D batch grid; returns (B, 1, 28, 28)."""
    w1t, b1r, w2t, b2r, w3t, b3r = prepared
    B, z_dim = z.shape

    # Batch tile: multiple of 8 (f32 sublane), capped at block_m (MXU M fill).
    tm = min(block_m, _round_up(B, SUBLANE))
    b_pad = _round_up(B, tm)
    if b_pad != B:
        z = jnp.pad(z, ((0, b_pad - B), (0, 0)))
    grid = (b_pad // tm,)

    h1p = w1t.shape[1]
    h2p = w2t.shape[1]
    flops = 2 * b_pad * (z_dim * h1p + h1p * h2p + h2p * OUT_PADDED)
    bytes_accessed = int(
        z.size * z.dtype.itemsize
        + sum(a.size * a.dtype.itemsize for a in prepared)
        + b_pad * OUT_PADDED * 4)
    cost = pl.CostEstimate(flops=flops,
                           transcendentals=b_pad * OUT_PADDED,
                           bytes_accessed=bytes_accessed)

    y_flat = pl.pallas_call(
        generation_net_kernel,
        out_shape=jax.ShapeDtypeStruct((b_pad, OUT_PADDED), jnp.float32),
        grid_spec=pltpu.PrefetchScalarGridSpec(
            num_scalar_prefetch=0,
            grid=grid,
            in_specs=[
                pl.BlockSpec((tm, z_dim), lambda i: (i, 0)),      # z tile
                pl.BlockSpec(w1t.shape, lambda i: (0, 0)),        # resident weights
                pl.BlockSpec(b1r.shape, lambda i: (0, 0)),
                pl.BlockSpec(w2t.shape, lambda i: (0, 0)),
                pl.BlockSpec(b2r.shape, lambda i: (0, 0)),
                pl.BlockSpec(w3t.shape, lambda i: (0, 0)),
                pl.BlockSpec(b3r.shape, lambda i: (0, 0)),
            ],
            out_specs=pl.BlockSpec((tm, OUT_PADDED), lambda i: (i, 0)),
        ),
        compiler_params=pltpu.CompilerParams(
            dimension_semantics=("parallel",),   # shard batch across TCs (v7x)
        ),
        cost_estimate=cost,
    )(z, w1t, b1r, w2t, b2r, w3t, b3r)

    # Drop batch / feature padding, then match PyTorch y.view(-1, 1, 28, 28).
    return y_flat[:B, :OUT_FEATURES].reshape(B, 1, 28, 28)


def init_params(key, z_dim, hidden_1, hidden_2):
    """Deterministic synthetic parameters (PyTorch Linear layout: (out, in))."""
    keys = jax.random.split(key, 6)

    def linear(kw, kb, fan_in, fan_out):
        bound = 1.0 / jnp.sqrt(fan_in)
        w = jax.random.uniform(kw, (fan_out, fan_in), jnp.float32, -bound, bound)
        b = jax.random.uniform(kb, (fan_out,), jnp.float32, -bound, bound)
        return w, b

    w1, b1 = linear(keys[0], keys[1], z_dim, hidden_1)
    w2, b2 = linear(keys[2], keys[3], hidden_1, hidden_2)
    w3, b3 = linear(keys[4], keys[5], hidden_2, 784)
    return (w1, b1, w2, b2, w3, b3)


if __name__ == "__main__":
    z_dim, hidden_1, hidden_2 = 16, 32, 64

    key = jax.random.PRNGKey(0)
    k_param, k_z1, k_z2 = jax.random.split(key, 3)
    params = init_params(k_param, z_dim, hidden_1, hidden_2)

    def reference(z, params):
        w1, b1, w2, b2, w3, b3 = params
        h1 = jnp.maximum(z @ w1.T + b1, 0.0)
        h2 = jnp.maximum(h1 @ w2.T + b2, 0.0)
        return jax.nn.sigmoid(h2 @ w3.T + b3).reshape(-1, 1, 28, 28)

    prepared_f32 = prepare_params(params, weight_dtype=jnp.float32)

    # Small batch: single grid step.
    z8 = jax.random.normal(k_z1, (8, z_dim), jnp.float32)
    y8 = jax.block_until_ready(generation_net_forward(z8, prepared_f32))
    ref8 = reference(z8, params)
    assert y8.shape == (8, 1, 28, 28), y8.shape
    assert jnp.allclose(y8, ref8, atol=1e-4, rtol=1e-4), "f32 mismatch (B=8)"

    # Larger non-multiple batch: exercises batch padding + 3-step parallel grid.
    z300 = jax.random.normal(k_z2, (300, z_dim), jnp.float32)
    y300 = jax.block_until_ready(generation_net_forward(z300, prepared_f32))
    ref300 = reference(z300, params)
    assert y300.shape == (300, 1, 28, 28), y300.shape
    assert jnp.allclose(y300, ref300, atol=1e-4, rtol=1e-4), "f32 mismatch (B=300)"

    # Optional bf16 weight path (MXU-friendly on v6e/v7x); f32 accum + epilogue.
    prepared_bf16 = prepare_params(params, weight_dtype=jnp.bfloat16)
    y8_bf16 = jax.block_until_ready(generation_net_forward(z8, prepared_bf16))
    assert jnp.allclose(y8_bf16, ref8, atol=5e-2), "bf16 mismatch (B=8)"

    print("KERNEL_OK")
</pallas_src>

<mosaic_0001>
module attributes {stable_mosaic.version = 11 : i64} {
  func.func @generation_net_kernel(%arg0: i32, %arg1: memref<8x16xf32, #tpu.memory_space<vmem>>, %arg2: memref<16x128xf32, #tpu.memory_space<vmem>>, %arg3: memref<1x128xf32, #tpu.memory_space<vmem>>, %arg4: memref<128x128xf32, #tpu.memory_space<vmem>>, %arg5: memref<1x128xf32, #tpu.memory_space<vmem>>, %arg6: memref<128x896xf32, #tpu.memory_space<vmem>>, %arg7: memref<1x896xf32, #tpu.memory_space<vmem>>, %arg8: memref<8x896xf32, #tpu.memory_space<vmem>>) attributes {dimension_semantics = [#tpu.dimension_semantics<parallel>], iteration_bounds = array<i64: 1>, scalar_prefetch = 0 : i64, scratch_operands = 0 : i64, tpu.core_type = #tpu.core_type<tc>, window_params = [{transform_indices = @transform_0, window_bounds = array<i64: 8, 16>}, {pipeline_mode = #tpu.pipeline_mode<synchronous>, transform_indices = @transform_1, window_bounds = array<i64: 16, 128>}, {pipeline_mode = #tpu.pipeline_mode<synchronous>, transform_indices = @transform_2, window_bounds = array<i64: 1, 128>}, {pipeline_mode = #tpu.pipeline_mode<synchronous>, transform_indices = @transform_3, window_bounds = array<i64: 128, 128>}, {pipeline_mode = #tpu.pipeline_mode<synchronous>, transform_indices = @transform_4, window_bounds = array<i64: 1, 128>}, {pipeline_mode = #tpu.pipeline_mode<synchronous>, transform_indices = @transform_5, window_bounds = array<i64: 128, 896>}, {pipeline_mode = #tpu.pipeline_mode<synchronous>, transform_indices = @transform_6, window_bounds = array<i64: 1, 896>}, {transform_indices = @transform_7, window_bounds = array<i64: 8, 896>}]} {
    %c0 = arith.constant 0 : index
    %c0_0 = arith.constant 0 : index
    %0 = vector.load %arg1[%c0, %c0_0] : memref<8x16xf32, #tpu.memory_space<vmem>>, vector<8x16xf32>
    %c0_1 = arith.constant 0 : index
    %c0_2 = arith.constant 0 : index
    %1 = vector.load %arg2[%c0_1, %c0_2] : memref<16x128xf32, #tpu.memory_space<vmem>>, vector<16x128xf32>
    %cst = arith.constant dense<0.000000e+00> : vector<8x128xf32>
    %2 = tpu.matmul %0, %1, %cst {dimension_numbers = #tpu.dot_dimension_numbers<[1], [0], [0], [1], [0, 0, 1, 1], [], []>} : vector<8x16xf32>, vector<16x128xf32>, vector<8x128xf32> -> vector<8x128xf32>
    %c0_3 = arith.constant 0 : index
    %c0_4 = arith.constant 0 : index
    %3 = vector.load %arg3[%c0_3, %c0_4] : memref<1x128xf32, #tpu.memory_space<vmem>>, vector<1x128xf32>
    %4 = vector.broadcast %3 : vector<1x128xf32> to vector<8x128xf32>
    %5 = arith.addf %2, %4 : vector<8x128xf32>
    %cst_5 = arith.constant 0.000000e+00 : f32
    %6 = vector.broadcast %cst_5 : f32 to vector<8x128xf32>
    %7 = arith.maximumf %5, %6 : vector<8x128xf32>
    %c0_6 = arith.constant 0 : index
    %c0_7 = arith.constant 0 : index
    %8 = vector.load %arg4[%c0_6, %c0_7] : memref<128x128xf32, #tpu.memory_space<vmem>>, vector<128x128xf32>
    %cst_8 = arith.constant dense<0.000000e+00> : vector<8x128xf32>
    %9 = tpu.matmul %7, %8, %cst_8 {dimension_numbers = #tpu.dot_dimension_numbers<[1], [0], [0], [1], [0, 0, 1, 1], [], []>} : vector<8x128xf32>, vector<128x128xf32>, vector<8x128xf32> -> vector<8x128xf32>
    %c0_9 = arith.constant 0 : index
    %c0_10 = arith.constant 0 : index
    %10 = vector.load %arg5[%c0_9, %c0_10] : memref<1x128xf32, #tpu.memory_space<vmem>>, vector<1x128xf32>
    %11 = vector.broadcast %10 : vector<1x128xf32> to vector<8x128xf32>
    %12 = arith.addf %9, %11 : vector<8x128xf32>
    %cst_11 = arith.constant 0.000000e+00 : f32
    %13 = vector.broadcast %cst_11 : f32 to vector<8x128xf32>
    %14 = arith.maximumf %12, %13 : vector<8x128xf32>
    %c0_12 = arith.constant 0 : index
    %c0_13 = arith.constant 0 : index
    %15 = vector.load %arg6[%c0_12, %c0_13] : memref<128x896xf32, #tpu.memory_space<vmem>>, vector<128x896xf32>
    %cst_14 = arith.constant dense<0.000000e+00> : vector<8x896xf32>
    %16 = tpu.matmul %14, %15, %cst_14 {dimension_numbers = #tpu.dot_dimension_numbers<[1], [0], [0], [1], [0, 0, 1, 1], [], []>} : vector<8x128xf32>, vector<128x896xf32>, vector<8x896xf32> -> vector<8x896xf32>
    %c0_15 = arith.constant 0 : index
    %c0_16 = arith.constant 0 : index
    %17 = vector.load %arg7[%c0_15, %c0_16] : memref<1x896xf32, #tpu.memory_space<vmem>>, vector<1x896xf32>
    %18 = vector.broadcast %17 : vector<1x896xf32> to vector<8x896xf32>
    %19 = arith.addf %16, %18 : vector<8x896xf32>
    %20 = arith.negf %19 : vector<8x896xf32>
    %21 = math.exp %20 : vector<8x896xf32>
    %cst_17 = arith.constant 1.000000e+00 : f32
    %22 = vector.broadcast %cst_17 : f32 to vector<8x896xf32>
    %23 = arith.addf %22, %21 : vector<8x896xf32>
    %24 = arith.divf %22, %23 : vector<8x896xf32>
    %c0_18 = arith.constant 0 : index
    %c0_19 = arith.constant 0 : index
    %25 = vector.load %arg8[%c0_18, %c0_19] : memref<8x896xf32, #tpu.memory_space<vmem>>, vector<8x896xf32>
    tpu.vector_store %arg8[%c0_18, %c0_19], %24 {strides = array<i32>} : memref<8x896xf32, #tpu.memory_space<vmem>>, vector<8x896xf32>,
    return
  }
  func.func @transform_0(%arg0: i32) -> (i32, i32) {
    %c0_i32 = arith.constant 0 : i32
    %c0_i32_0 = arith.constant 0 : i32
    return %arg0, %c0_i32 : i32, i32
  }
  func.func @transform_1(%arg0: i32) -> (i32, i32) {
    %c0_i32 = arith.constant 0 : i32
    %c0_i32_0 = arith.constant 0 : i32
    %c0_i32_1 = arith.constant 0 : i32
    return %c0_i32, %c0_i32_0 : i32, i32
  }
  func.func @transform_2(%arg0: i32) -> (i32, i32) {
    %c0_i32 = arith.constant 0 : i32
    %c0_i32_0 = arith.constant 0 : i32
    %c0_i32_1 = arith.constant 0 : i32
    return %c0_i32, %c0_i32_0 : i32, i32
  }
  func.func @transform_3(%arg0: i32) -> (i32, i32) {
    %c0_i32 = arith.constant 0 : i32
    %c0_i32_0 = arith.constant 0 : i32
    %c0_i32_1 = arith.constant 0 : i32
    return %c0_i32, %c0_i32_0 : i32, i32
  }
  func.func @transform_4(%arg0: i32) -> (i32, i32) {
    %c0_i32 = arith.constant 0 : i32
    %c0_i32_0 = arith.constant 0 : i32
    %c0_i32_1 = arith.constant 0 : i32
    return %c0_i32, %c0_i32_0 : i32, i32
  }
  func.func @transform_5(%arg0: i32) -> (i32, i32) {
    %c0_i32 = arith.constant 0 : i32
    %c0_i32_0 = arith.constant 0 : i32
    %c0_i32_1 = arith.constant 0 : i32
    return %c0_i32, %c0_i32_0 : i32, i32
  }
  func.func @transform_6(%arg0: i32) -> (i32, i32) {
    %c0_i32 = arith.constant 0 : i32
    %c0_i32_0 = arith.constant 0 : i32
    %c0_i32_1 = arith.constant 0 : i32
    return %c0_i32, %c0_i32_0 : i32, i32
  }
  func.func @transform_7(%arg0: i32) -> (i32, i32) {
    %c0_i32 = arith.constant 0 : i32
    %c0_i32_0 = arith.constant 0 : i32
    return %arg0, %c0_i32 : i32, i32
  }
}

</mosaic_0001>

<bundles_post_ra>
// kernel: generation_net_forward.1
= control target key start
LH: loop header
LB: loop body
LE: loop exit
PB: predicated region body
PF: predicated region fallthrough
CT: control target
= control target key end

     0   :  { %12 = vsyncpa [#allocation3], 0  ;;  %s888_s0 = inlined_call_operand.hbm [shape: f32[8,16], index: 0, kind: input, shape index: {}]   ;;  %s889_s1 = inlined_call_operand.hbm [shape: f32[16,128], index: 1, kind: input, shape index: {}]   ;;  %s890_s2 = inlined_call_operand.vmem [shape: f32[1,128], index: 2, kind: input, shape index: {}]   ;;  %s891_s3 = inlined_call_operand.hbm [shape: f32[128,128], index: 3, kind: input, shape index: {}]   ;;  %s892_s4 = inlined_call_operand.vmem [shape: f32[1,128], index: 4, kind: input, shape index: {}]   ;;  %s893_s5 = inlined_call_operand.hbm [shape: f32[128,896], index: 5, kind: input, shape index: {}]   ;;  %s894_s6 = inlined_call_operand.hbm [shape: f32[1,896], index: 6, kind: input, shape index: {}]   ;;  %s895_s7 = inlined_call_operand.vmem [shape: f32[8,896], index: 7, kind: output, shape index: {}]  }
   0x1   :  { %13 = vsyncpa [#allocation5], 0  ;;  %s30_s26 = sshll.u32 %s889_s1, 4  ;;  %s31_s26 = int_to_ptr.hbm [resolvable:$true] %s30_s26 }
   0x2   :  { %14 = vsyncpa [#allocation8], 0  ;;  %s761_s27 = smov [#allocation4]   ;;  %s60_s8 = sshll.u32 %s893_s5, 4  ;;  %s61_s8 = int_to_ptr.hbm [resolvable:$true] %s60_s8 }
   0x3   :  { %s32_s28 = sshll.u32 %s761_s27, 4  ;;  %s762_s9 = smov 128   ;;  %s33_s28 = int_to_ptr.vmem [resolvable:$true] %s32_s28 }
   0x4   :  { %s763_s10 = smov 8   ;;  %s764_s11 = smov [#allocation7]  }
   0x5   :  { %38 = dma.hbm_to_vmem [thread:$0]  %s31_s26, 256, %s33_s28, [#allocation5], %s762_s9, %s762_s9, %s763_s10  }
   0x6   :  { %s62_s12 = sshll.u32 %s764_s11, 4  ;;  %s765_s13 = smov 896   ;;  %s63_s12 = int_to_ptr.vmem [resolvable:$true] %s62_s12 }
   0x7   :  { %s766_s14 = smov 56   ;;  %s20_s16 = sshll.u32 %s888_s0, 4  ;;  %s21_s16 = int_to_ptr.hbm [resolvable:$true] %s20_s16 }
   0x8   :  { %68 = dma.hbm_to_vmem [thread:$0]  %s61_s8, 14336, %s63_s12, [#allocation8], %s765_s13, %s765_s13, %s766_s14  }
   0x9   :  { %s767_s17 = smov [#allocation2]   ;;  %s45_s20 = sshll.u32 %s891_s3, 4  ;;  %s46_s20 = int_to_ptr.hbm [resolvable:$true] %s45_s20 }
   0xa   :  { %s22_s18 = sshll.u32 %s767_s17, 4  ;;  %s768_s21 = smov [#allocation6]   ;;  %s23_s18 = int_to_ptr.vmem [resolvable:$true] %s22_s18 }
   0xb   :  { %25 = dma.hbm_to_vmem [thread:$0]  %s21_s16, 128, %s23_s18, [#allocation3]  }
   0xc   :  { %s47_s22 = sshll.u32 %s768_s21, 4  ;;  %s74_s25 = sshll.u32 %s894_s6, 4  ;;  %s48_s22 = int_to_ptr.vmem [resolvable:$true] %s47_s22  ;;  %s75_s25 = int_to_ptr.hbm [resolvable:$true] %s74_s25 }
   0xd   :  { %53 = dma.hbm_to_vmem [thread:$0]  %s46_s20, 2048, %s48_s22, [#allocation5], %s762_s9, %s762_s9, %s763_s10  }
   0xe   :  { %s769_s0 = smov [#allocation9]  }
   0xf   :  { %s76_s26 = sshll.u32 %s769_s0, 4  ;;  %s77_s26 = int_to_ptr.vmem [resolvable:$true] %s76_s26 }
  0x10   :  { %79 = dma.hbm_to_vmem [thread:$0]  %s75_s25, 112, %s77_s26, [#allocation8]  }
  0x11   :  { %755 = dma.done.wait [#allocation3], 128  }
  0x12   :  { %756 = vsyncadd [#allocation3], 4294967168 }
  0x13   :  { %757 = dma.done.wait [#allocation5], 2304  }
  0x14   :  { %758 = vsyncadd [#allocation5], 4294964992 }
  0x15   :  { %759 = dma.done.wait [#allocation8], 14448  }
  0x16   :  { %760 = vsyncadd [#allocation8], 4294952848  ;;  %v102_v0 = vld [vmem:[#allocation4 + $0x8] sm:$0xff]  ;;  %v101_v1 = vld [vmem:[#allocation4] sm:$0xff]  ;;  %vm107_vm0 = vcmask 130048  }
  0x17   :  { %125 = vmatpush.msra.mxu0 %v102_v0  ;;  %v100_v2 = vld [vmem:[#allocation2] sm:$0xff]  ;;  %v147_v3 = vld [vmem:[#allocation6 + $0x78] sm:$0xff]  ;;  %v146_v4 = vld [vmem:[#allocation6 + $0x70] sm:$0xff] }
  0x18   :  { %152 = vmatpush.msra.mxu1 %v147_v3  ;;  %v145_v5 = vld [vmem:[#allocation6 + $0x68] sm:$0xff]  ;;  %v144_v6 = vld [vmem:[#allocation6 + $0x60] sm:$0xff]  ;;  %v143_v7 = vld [vmem:[#allocation6 + $0x58] sm:$0xff] }
  0x19   :  { %126 = vmatpush.msra.mxu0 %v101_v1  ;;  %v142_v8 = vld [vmem:[#allocation6 + $0x50] sm:$0xff]  ;;  %v141_v9 = vld [vmem:[#allocation6 + $0x48] sm:$0xff]  ;;  %v140_v10 = vld [vmem:[#allocation6 + $0x40] sm:$0xff] }
  0x1a   :  { %588 = vmatmul.msk.f32.vlgmr.msra.gmra.mxu0 %vm107_vm0, %v100_v2  ;;  %153 = vmatpush.msra.mxu1 %v146_v4  ;;  %v139_v11 = vld [vmem:[#allocation6 + $0x38] sm:$0xff]  ;;  %v138_v12 = vld [vmem:[#allocation6 + $0x30] sm:$0xff]  ;;  %v137_v13 = vld [vmem:[#allocation6 + $0x28] sm:$0xff] }
  0x1b   :  { %v136_v14 = vld [vmem:[#allocation6 + $0x20] sm:$0xff]  ;;  %v135_v15 = vld [vmem:[#allocation6 + $0x18] sm:$0xff]  ;;  %v134_v16 = vld [vmem:[#allocation6 + $0x10] sm:$0xff] }
  0x1c   :  { %154 = vmatpush.msra.mxu1 %v145_v5  ;;  %v133_v17 = vld [vmem:[#allocation6 + $0x8] sm:$0xff]  ;;  %v132_v18 = vld [vmem:[#allocation6] sm:$0xff]  ;;  %v279_v20 = vld [vmem:[#allocation7 + $0x350] sm:$0xff] }
  0x1d   :  { %v278_v19 = vld [vmem:[#allocation7 + $0x348] sm:$0xff]  ;;  %v280_v21 = vld [vmem:[#allocation7 + $0x358] sm:$0xff]  ;;  %321 = vmatpush.msra.mxu3 %v279_v20  ;;  %v271_v22 = vld [vmem:[#allocation7 + $0x310] sm:$0xff] }
  0x1e   :  { %155 = vmatpush.msra.mxu1 %v144_v6  ;;  %301 = vmatpush.msra.mxu2 %v278_v19  ;;  %v272_v23 = vld [vmem:[#allocation7 + $0x318] sm:$0xff]  ;;  %v273_v24 = vld [vmem:[#allocation7 + $0x320] sm:$0xff]  ;;  %v266_v27 = vld [vmem:[#allocation7 + $0x2e8] sm:$0xff] }
  0x1f   :  { %341 = vmatpush.msrb.mxu0 %v280_v21  ;;  %v264_v25 = vld [vmem:[#allocation7 + $0x2d8] sm:$0xff]  ;;  %v265_v26 = vld [vmem:[#allocation7 + $0x2e0] sm:$0xff]  ;;  %322 = vmatpush.msra.mxu3 %v272_v23  ;;  %v258_v29 = vld [vmem:[#allocation7 + $0x2a8] sm:$0xff] }
  0x20   :  { %156 = vmatpush.msra.mxu1 %v143_v7  ;;  %302 = vmatpush.msra.mxu2 %v271_v22  ;;  %v257_v28 = vld [vmem:[#allocation7 + $0x2a0] sm:$0xff]  ;;  %v259_v30 = vld [vmem:[#allocation7 + $0x2b0] sm:$0xff]  ;;  %v250_v31 = vld [vmem:[#allocation7 + $0x268] sm:$0xff] }
  0x21   :  { %342 = vmatpush.msrb.mxu0 %v273_v24  ;;  %323 = vmatpush.msra.mxu3 %v265_v26  ;;  %v251_v32 = vld [vmem:[#allocation7 + $0x270] sm:$0xff]  ;;  %v252_v33 = vld [vmem:[#allocation7 + $0x278] sm:$0xff]  ;;  %v245_v36 = vld [vmem:[#allocation7 + $0x240] sm:$0xff] }
  0x22   :  { %157 = vmatpush.msra.mxu1 %v142_v8  ;;  %303 = vmatpush.msra.mxu2 %v264_v25  ;;  %v243_v34 = vld [vmem:[#allocation7 + $0x230] sm:$0xff]  ;;  %v244_v35 = vld [vmem:[#allocation7 + $0x238] sm:$0xff]  ;;  %v237_v38 = vld [vmem:[#allocation7 + $0x200] sm:$0xff] }
  0x23   :  { %343 = vmatpush.msrb.mxu0 %v266_v27  ;;  %324 = vmatpush.msra.mxu3 %v258_v29  ;;  %v236_v37 = vld [vmem:[#allocation7 + $0x1f8] sm:$0xff]  ;;  %v238_v39 = vld [vmem:[#allocation7 + $0x208] sm:$0xff]  ;;  %v229_v40 = vld [vmem:[#allocation7 + $0x1c0] sm:$0xff] }
  0x24   :  { %158 = vmatpush.msra.mxu1 %v141_v9  ;;  %304 = vmatpush.msra.mxu2 %v257_v28  ;;  %v230_v41 = vld [vmem:[#allocation7 + $0x1c8] sm:$0xff]  ;;  %v281_v42 = vld [vmem:[#allocation7 + $0x360] sm:$0xff]  ;;  %v231_v43 = vld [vmem:[#allocation7 + $0x1d0] sm:$0xff] }
  0x25   :  { %344 = vmatpush.msrb.mxu0 %v259_v30  ;;  %325 = vmatpush.msra.mxu3 %v251_v32  ;;  %v274_v44 = vld [vmem:[#allocation7 + $0x328] sm:$0xff]  ;;  %v223_v46 = vld [vmem:[#allocation7 + $0x190] sm:$0xff]  ;;  %v224_v47 = vld [vmem:[#allocation7 + $0x198] sm:$0xff] }
  0x26   :  { %159 = vmatpush.msra.mxu1 %v140_v10  ;;  %305 = vmatpush.msra.mxu2 %v250_v31  ;;  %v222_v45 = vld [vmem:[#allocation7 + $0x188] sm:$0xff]  ;;  %v267_v48 = vld [vmem:[#allocation7 + $0x2f0] sm:$0xff]  ;;  %v216_v50 = vld [vmem:[#allocation7 + $0x158] sm:$0xff] }
  0x27   :  { %345 = vmatpush.msrb.mxu0 %v252_v33  ;;  %326 = vmatpush.msra.mxu3 %v244_v35  ;;  %v215_v49 = vld [vmem:[#allocation7 + $0x150] sm:$0xff]  ;;  %v217_v51 = vld [vmem:[#allocation7 + $0x160] sm:$0xff]  ;;  %v260_v52 = vld [vmem:[#allocation7 + $0x2b8] sm:$0xff] }
  0x28   :  { %160 = vmatpush.msra.mxu1 %v139_v11  ;;  %306 = vmatpush.msra.mxu2 %v243_v34  ;;  %v208_v53 = vld [vmem:[#allocation7 + $0x118] sm:$0xff]  ;;  %v209_v54 = vld [vmem:[#allocation7 + $0x120] sm:$0xff]  ;;  %v210_v55 = vld [vmem:[#allocation7 + $0x128] sm:$0xff] }
  0x29   :  { %346 = vmatpush.msrb.mxu0 %v245_v36  ;;  %327 = vmatpush.msra.mxu3 %v237_v38  ;;  %v253_v56 = vld [vmem:[#allocation7 + $0x280] sm:$0xff]  ;;  %v202_v58 = vld [vmem:[#allocation7 + $0xe8] sm:$0xff]  ;;  %v203_v59 = vld [vmem:[#allocation7 + $0xf0] sm:$0xff] }
  0x2a   :  { %161 = vmatpush.msra.mxu1 %v138_v12  ;;  %307 = vmatpush.msra.mxu2 %v236_v37  ;;  %v201_v57 = vld [vmem:[#allocation7 + $0xe0] sm:$0xff]  ;;  %v246_v60 = vld [vmem:[#allocation7 + $0x248] sm:$0xff]  ;;  %v195_v62 = vld [vmem:[#allocation7 + $0xb0] sm:$0xff] }
  0x2b   :  { %347 = vmatpush.msrb.mxu0 %v238_v39  ;;  %328 = vmatpush.msra.mxu3 %v230_v41  ;;  %v194_v61 = vld [vmem:[#allocation7 + $0xa8] sm:$0xff]  ;;  %v196_v63 = vld [vmem:[#allocation7 + $0xb8] sm:$0xff]  ;;  %v239_v0 = vld [vmem:[#allocation7 + $0x210] sm:$0xff] }
  0x2c   :  { %162 = vmatpush.msra.mxu1 %v137_v13  ;;  %308 = vmatpush.msra.mxu2 %v229_v40  ;;  %v605_v1 = vld [vmem:[%s890_s2] ss:$0 sm:$0xff]  ;;  %v187_v2 = vld [vmem:[#allocation7 + $0x70] sm:$0xff]  ;;  %v188_v3 = vld [vmem:[#allocation7 + $0x78] sm:$0xff] }
  0x2d   :  { %348 = vmatpush.msrb.mxu0 %v231_v43  ;;  %329 = vmatpush.msra.mxu3 %v223_v46  ;;  %v189_v4 = vld [vmem:[#allocation7 + $0x80] sm:$0xff]  ;;  %v232_v5 = vld [vmem:[#allocation7 + $0x1d8] sm:$0xff]  ;;  %v182_v9 = vld [vmem:[#allocation7 + $0x48] sm:$0xff] }
  0x2e   :  { %163 = vmatpush.msra.mxu1 %v136_v14  ;;  %309 = vmatpush.msra.mxu2 %v222_v45  ;;  %v180_v6 = vld [vmem:[#allocation7 + $0x38] sm:$0xff]  ;;  %v181_v7 = vld [vmem:[#allocation7 + $0x40] sm:$0xff]  ;;  %v174_v13 = vld [vmem:[#allocation7 + $0x8] sm:$0xff] }
  0x2f   :  { %349 = vmatpush.msrb.mxu0 %v224_v47  ;;  %330 = vmatpush.msra.mxu3 %v216_v50  ;;  %v225_v10 = vld [vmem:[#allocation7 + $0x1a0] sm:$0xff]  ;;  %v175_v14 = vld [vmem:[#allocation7 + $0x10] sm:$0xff]  ;;  %v218_v19 = vld [vmem:[#allocation7 + $0x168] sm:$0xff] }
  0x30   :  { %164 = vmatpush.msra.mxu1 %v135_v15  ;;  %310 = vmatpush.msra.mxu2 %v215_v49  ;;  %v173_v12 = vld [vmem:[#allocation7] sm:$0xff]  ;;  %v275_v20 = vld [vmem:[#allocation7 + $0x330] sm:$0xff]  ;;  %v276_v21 = vld [vmem:[#allocation7 + $0x338] sm:$0xff] }
  0x31   :  { %350 = vmatpush.msrb.mxu0 %v217_v51  ;;  %331 = vmatpush.msra.mxu3 %v209_v54  ;;  %v277_v22 = vld [vmem:[#allocation7 + $0x340] sm:$0xff]  ;;  %v211_v23 = vld [vmem:[#allocation7 + $0x130] sm:$0xff]  ;;  %v268_v24 = vld [vmem:[#allocation7 + $0x2f8] sm:$0xff] }
  0x32   :  { %165 = vmatpush.msra.mxu1 %v134_v16  ;;  %311 = vmatpush.msra.mxu2 %v208_v53  ;;  %v282_v16 = vld [vmem:[#allocation7 + $0x368] sm:$0xff]  ;;  %v269_v25 = vld [vmem:[#allocation7 + $0x300] sm:$0xff]  ;;  %v204_v27 = vld [vmem:[#allocation7 + $0xf8] sm:$0xff] }
  0x33   :  { %351 = vmatpush.msrb.mxu0 %v210_v55  ;;  %332 = vmatpush.msra.mxu3 %v202_v58  ;;  %v270_v26 = vld [vmem:[#allocation7 + $0x308] sm:$0xff]  ;;  %v261_v28 = vld [vmem:[#allocation7 + $0x2c0] sm:$0xff]  ;;  %v263_v30 = vld [vmem:[#allocation7 + $0x2d0] sm:$0xff] }
  0x34   :  { %166 = vmatpush.msra.mxu1 %v133_v17  ;;  %312 = vmatpush.msra.mxu2 %v201_v57  ;;  %v283_v17 = vld [vmem:[#allocation7 + $0x370] sm:$0xff]  ;;  %v262_v29 = vld [vmem:[#allocation7 + $0x2c8] sm:$0xff]  ;;  %v197_v31 = vld [vmem:[#allocation7 + $0xc0] sm:$0xff] }
  0x35   :  { %352 = vmatpush.msrb.mxu0 %v203_v59  ;;  %333 = vmatpush.msra.mxu3 %v195_v62  ;;  %v254_v32 = vld [vmem:[#allocation7 + $0x288] sm:$0xff]  ;;  %v255_v33 = vld [vmem:[#allocation7 + $0x290] sm:$0xff]  ;;  %v256_v34 = vld [vmem:[#allocation7 + $0x298] sm:$0xff] }
  0x36   :  { %167 = vmatpush.msra.mxu1 %v132_v18  ;;  %313 = vmatpush.msra.mxu2 %v194_v61  ;;  %v284_v18 = vld [vmem:[#allocation7 + $0x378] sm:$0xff]  ;;  %v247_v35 = vld [vmem:[#allocation7 + $0x250] sm:$0xff]  ;;  %v249_v37 = vld [vmem:[#allocation7 + $0x260] sm:$0xff] }
  0x37   :  { %353 = vmatpush.msrb.mxu0 %v196_v63  ;;  %334 = vmatpush.msra.mxu3 %v188_v3  ;;  %v248_v36 = vld [vmem:[#allocation7 + $0x258] sm:$0xff]  ;;  %v241_v39 = vld [vmem:[#allocation7 + $0x220] sm:$0xff]  ;;  %v242_v40 = vld [vmem:[#allocation7 + $0x228] sm:$0xff] }
  0x38   :  { %361 = vmatpush.msrb.mxu1 %v281_v42  ;;  %314 = vmatpush.msra.mxu2 %v187_v2  ;;  %v240_v38 = vld [vmem:[#allocation7 + $0x218] sm:$0xff]  ;;  %v233_v41 = vld [vmem:[#allocation7 + $0x1e0] sm:$0xff]  ;;  %v234_v42 = vld [vmem:[#allocation7 + $0x1e8] sm:$0xff] }
  0x39   :  { %354 = vmatpush.msrb.mxu0 %v189_v4  ;;  %335 = vmatpush.msra.mxu3 %v181_v7  ;;  %v235_v43 = vld [vmem:[#allocation7 + $0x1f0] sm:$0xff]  ;;  %v228_v46 = vld [vmem:[#allocation7 + $0x1b8] sm:$0xff]  ;;  %v190_v47 = vld [vmem:[#allocation7 + $0x88] sm:$0xff] }
  0x3a   :  { %362 = vmatpush.msrb.mxu1 %v274_v44  ;;  %315 = vmatpush.msra.mxu2 %v180_v6  ;;  %v226_v44 = vld [vmem:[#allocation7 + $0x1a8] sm:$0xff]  ;;  %v227_v45 = vld [vmem:[#allocation7 + $0x1b0] sm:$0xff]  ;;  %v220_v49 = vld [vmem:[#allocation7 + $0x178] sm:$0xff] }
  0x3b   :  { %355 = vmatpush.msrb.mxu0 %v182_v9  ;;  %336 = vmatpush.msra.mxu3 %v174_v13  ;;  %v221_v50 = vld [vmem:[#allocation7 + $0x180] sm:$0xff]  ;;  %v183_v51 = vld [vmem:[#allocation7 + $0x50] sm:$0xff]  ;;  %v214_v54 = vld [vmem:[#allocation7 + $0x148] sm:$0xff] }
  0x3c   :  { %363 = vmatpush.msrb.mxu1 %v267_v48  ;;  %316 = vmatpush.msra.mxu2 %v173_v12  ;;  %v219_v48 = vld [vmem:[#allocation7 + $0x170] sm:$0xff]  ;;  %v213_v53 = vld [vmem:[#allocation7 + $0x140] sm:$0xff]  ;;  %v176_v55 = vld [vmem:[#allocation7 + $0x18] sm:$0xff] }
  0x3d   :  { %356 = vmatpush.msrb.mxu0 %v175_v14  ;;  %401 = vmatpush.msrb.mxu3 %v283_v17  ;;  %v206_v57 = vld [vmem:[#allocation7 + $0x108] sm:$0xff]  ;;  %v207_v58 = vld [vmem:[#allocation7 + $0x110] sm:$0xff]  ;;  %v200_v61 = vld [vmem:[#allocation7 + $0xd8] sm:$0xff] }
  0x3e   :  { %364 = vmatpush.msrb.mxu1 %v260_v52  ;;  %381 = vmatpush.msrb.mxu2 %v282_v16  ;;  %v212_v52 = vld [vmem:[#allocation7 + $0x138] sm:$0xff]  ;;  %v198_v59 = vld [vmem:[#allocation7 + $0xc8] sm:$0xff]  ;;  %v191_v62 = vld [vmem:[#allocation7 + $0x90] sm:$0xff] }
  0x3f   :  { %421 = vmatpush.msra.mxu0 %v284_v18  ;;  %402 = vmatpush.msrb.mxu3 %v276_v21  ;;  %v192_v63 = vld [vmem:[#allocation7 + $0x98] sm:$0xff]  ;;  %v185_v2 = vld [vmem:[#allocation7 + $0x60] sm:$0xff]  ;;  %v186_v3 = vld [vmem:[#allocation7 + $0x68] sm:$0xff] }
  0x40   :  { %365 = vmatpush.msrb.mxu1 %v253_v56  ;;  %382 = vmatpush.msrb.mxu2 %v275_v20  ;;  %v205_v56 = vld [vmem:[#allocation7 + $0x100] sm:$0xff]  ;;  %v179_v6 = vld [vmem:[#allocation7 + $0x30] sm:$0xff]  ;;  %v606_v7 = vld [vmem:[%s892_s4] ss:$0 sm:$0xff] }
  0x41   :  { %422 = vmatpush.msra.mxu0 %v277_v22  ;;  %403 = vmatpush.msrb.mxu3 %v269_v25  ;;  %v177_v4 = vld [vmem:[#allocation7 + $0x20] sm:$0xff] }
  0x42   :  { %366 = vmatpush.msrb.mxu1 %v246_v60  ;;  %383 = vmatpush.msrb.mxu2 %v268_v24  ;;  %v199_v60 = vld [vmem:[#allocation7 + $0xd0] sm:$0xff] }
  0x43   :  { %423 = vmatpush.msra.mxu0 %v270_v26  ;;  %404 = vmatpush.msrb.mxu3 %v262_v29 }
  0x44   :  { %367 = vmatpush.msrb.mxu1 %v239_v0  ;;  %384 = vmatpush.msrb.mxu2 %v261_v28  ;;  %v193_v0 = vld [vmem:[#allocation7 + $0xa0] sm:$0xff] }
  0x45   :  { %424 = vmatpush.msra.mxu0 %v263_v30  ;;  %405 = vmatpush.msrb.mxu3 %v255_v33 }
  0x46   :  { %368 = vmatpush.msrb.mxu1 %v232_v5  ;;  %385 = vmatpush.msrb.mxu2 %v254_v32  ;;  %v178_v5 = vld [vmem:[#allocation7 + $0x28] sm:$0xff] }
  0x47   :  { %425 = vmatpush.msra.mxu0 %v256_v34  ;;  %406 = vmatpush.msrb.mxu3 %v248_v36 }
  0x48   :  { %369 = vmatpush.msrb.mxu1 %v225_v10  ;;  %386 = vmatpush.msrb.mxu2 %v247_v35 }
  0x49   :  { %426 = vmatpush.msra.mxu0 %v249_v37  ;;  %407 = vmatpush.msrb.mxu3 %v241_v39 }
  0x4a   :  { %370 = vmatpush.msrb.mxu1 %v218_v19  ;;  %387 = vmatpush.msrb.mxu2 %v240_v38 }
  0x4b   :  { %427 = vmatpush.msra.mxu0 %v242_v40  ;;  %408 = vmatpush.msrb.mxu3 %v234_v42 }
  0x4c   :  { %371 = vmatpush.msrb.mxu1 %v211_v23  ;;  %388 = vmatpush.msrb.mxu2 %v233_v41 }
  0x4d   :  { %428 = vmatpush.msra.mxu0 %v235_v43  ;;  %409 = vmatpush.msrb.mxu3 %v227_v45 }
  0x4e   :  { %372 = vmatpush.msrb.mxu1 %v204_v27  ;;  %389 = vmatpush.msrb.mxu2 %v226_v44 }
  0x4f   :  { %429 = vmatpush.msra.mxu0 %v228_v46  ;;  %410 = vmatpush.msrb.mxu3 %v220_v49 }
  0x50   :  { %373 = vmatpush.msrb.mxu1 %v197_v31  ;;  %390 = vmatpush.msrb.mxu2 %v219_v48 }
  0x51   :  { %430 = vmatpush.msra.mxu0 %v221_v50  ;;  %411 = vmatpush.msrb.mxu3 %v213_v53 }
  0x52   :  { %374 = vmatpush.msrb.mxu1 %v190_v47  ;;  %391 = vmatpush.msrb.mxu2 %v212_v52 }
  0x53   :  { %431 = vmatpush.msra.mxu0 %v214_v54  ;;  %412 = vmatpush.msrb.mxu3 %v206_v57 }
  0x54   :  { %375 = vmatpush.msrb.mxu1 %v183_v51  ;;  %392 = vmatpush.msrb.mxu2 %v205_v56 }
  0x55   :  { %432 = vmatpush.msra.mxu0 %v207_v58  ;;  %413 = vmatpush.msrb.mxu3 %v199_v60 }
  0x56   :  { %376 = vmatpush.msrb.mxu1 %v176_v55  ;;  %393 = vmatpush.msrb.mxu2 %v198_v59 }
  0x57   :  { %433 = vmatpush.msra.mxu0 %v200_v61  ;;  %414 = vmatpush.msrb.mxu3 %v192_v63 }
  0x58   :  { %394 = vmatpush.msrb.mxu2 %v191_v62 }
  0x59   :  { %434 = vmatpush.msra.mxu0 %v193_v0  ;;  %415 = vmatpush.msrb.mxu3 %v185_v2 }
  0x5b   :  { %435 = vmatpush.msra.mxu0 %v186_v3  ;;  %416 = vmatpush.msrb.mxu3 %v178_v5 }
  0x5d   :  { %436 = vmatpush.msra.mxu0 %v179_v6 }
  0x97   :  { %v128_v8 = vpop.f32.mrf.mxu0 }
  0x98   :  { %v129_v11 = vadd.f32 %v605_v1, %v128_v8  ;;  %v184_v1 = vld [vmem:[#allocation7 + $0x58] sm:$0xff] }
  0x99   :  { %395 = vmatpush.msrb.mxu2 %v184_v1 }
  0x9a   :  { %v131_v15 = vmax.f32 %v129_v11, 0.0  ;;  %v285_v11 = vld [vmem:[#allocation9] sm:$0xff] }
  0x9b   :  { %396 = vmatpush.msrb.mxu2 %v177_v4  ;;  %v289_v12 = vperm.slane %v285_v11, 2  ;;  %v290_v13 = vperm.slane %v285_v11, 3  ;;  %v287_v18 = vperm.slane %v285_v11, 0  ;;  %v288_v19 = vperm.slane %v285_v11, 1 }
  0x9c   :  { %168 = vmatmul.f32.vlgmr.msra.gmra.mxu1 %v131_v15  ;;  %v293_v24 = vperm.slane %v285_v11, 6  ;;  %v291_v35 = vperm.slane %v285_v11, 4  ;;  %v292_v36 = vperm.slane %v285_v11, 5 }
 0x119   :  { %v169_v8 = vpop.f32.mrf.mxu1 }
 0x11a   :  { %v170_v9 = vadd.f32 %v606_v7, %v169_v8 }
 0x11c   :  { %v172_v10 = vmax.f32 %v170_v9, 0.0 }
 0x11e   :  { %317 = vmatmul.f32.vlgmr.msra.gmra.mxu2 %v172_v10  ;;  %337 = vmatmul.f32.vlgmr.msra.gmra.mxu3 %v172_v10 }
 0x11f   :  { %357 = vmatmul.f32.vlgmr.msrb.gmra.mxu0 %v172_v10  ;;  %377 = vmatmul.f32.vlgmr.msrb.gmra.mxu1 %v172_v10 }
 0x126   :  { %397 = vmatmul.f32.vlgmr.msrb.gmra.mxu2 %v172_v10  ;;  %417 = vmatmul.f32.vlgmr.msrb.gmra.mxu3 %v172_v10 }
 0x127   :  { %437 = vmatmul.f32.vlgmr.msra.gmra.mxu0 %v172_v10 }
 0x19c   :  { %v358_v14 = vpop.f32.mrf.mxu0  ;;  %v378_v15 = vpop.f32.mrf.mxu1 }
 0x19d   :  { %v359_v16 = vadd.f32 %v358_v14, %v289_v12  ;;  %v379_v17 = vadd.f32 %v378_v15, %v290_v13 }
 0x19f   :  { %v591_v20 = vmul.f32 -1.442695, %v359_v16  ;;  %v592_v21 = vmul.f32 -1.442695, %v379_v17 }
 0x1a1   :  { %607 = vpow2.f32 %v591_v20  ;;  %v318_v22 = vpop.f32.mrf.mxu2  ;;  %v338_v23 = vpop.f32.mrf.mxu3 }
 0x1a2   :  { %609 = vpow2.f32 %v592_v21  ;;  %v319_v25 = vadd.f32 %v318_v22, %v287_v18  ;;  %v339_v26 = vadd.f32 %v338_v23, %v288_v19 }
 0x1a4   :  { %v589_v27 = vmul.f32 -1.442695, %v319_v25  ;;  %v590_v28 = vmul.f32 -1.442695, %v339_v26  ;;  %v438_v29 = vpop.f32.mrf.mxu0 }
 0x1a5   :  { %v439_v30 = vadd.f32 %v438_v29, %v293_v24 }
 0x1a6   :  { %611 = vpow2.f32 %v589_v27 }
 0x1a7   :  { %v608_v31 = vpop.eup %607  ;;  %613 = vpow2.f32 %v590_v28  ;;  %v595_v32 = vmul.f32 -1.442695, %v439_v30 }
 0x1a8   :  { %v610_v33 = vpop.eup %609  ;;  %v464_v34 = vadd.f32 1.0, %v608_v31 }
 0x1a9   :  { %v465_v37 = vadd.f32 1.0, %v610_v33  ;;  %615 = vpow2.f32 %v595_v32  ;;  %v398_v38 = vpop.f32.mrf.mxu2  ;;  %v418_v39 = vpop.f32.mrf.mxu3 }
 0x1aa   :  { %617 = vrcp.f32 %v464_v34  ;;  %v399_v41 = vadd.f32 %v398_v38, %v291_v35  ;;  %v419_v42 = vadd.f32 %v418_v39, %v292_v36  ;;  %v508_v49 = vand.u32 2147483647, %v464_v34 }
 0x1ab   :  { %619 = vrcp.f32 %v465_v37  ;;  %v510_v53 = vand.u32 2147483648, %v464_v34  ;;  %vm504_vm1 = vweird.f32 %v464_v34  ;;  %v523_v55 = vand.u32 2147483647, %v465_v37 }
 0x1ac   :  { %v612_v40 = vpop.eup %611  ;;  %v593_v47 = vmul.f32 -1.442695, %v399_v41  ;;  %v594_v50 = vmul.f32 -1.442695, %v419_v42  ;;  %v525_v57 = vand.u32 2147483648, %v465_v37  ;;  %vm839_vm2 = vcmp.eq.f32.partialorder %v508_v49, 8.507059e+37 }
 0x1ad   :  { %v614_v43 = vpop.eup %613  ;;  %v831_v44 = vadd.f32 1.0, %v612_v40  ;;  %vm519_vm3 = vweird.f32 %v465_v37  ;;  %v511_v63 = vor.u32 1.1754944e-38, %v510_v53  ;;  %vm844_vm6 = vcmp.eq.f32.partialorder %v523_v55, 8.507059e+37 }
 0x1ae   :  { %v833_v45 = vadd.f32 1.0, %v614_v43  ;;  %v526_v5 = vor.u32 1.1754944e-38, %v525_v57 }
 0x1af   :  { %v616_v46 = vpop.eup %615  ;;  %621 = vrcp.f32 %v831_v44  ;;  %v478_v6 = vand.u32 2147483647, %v831_v44  ;;  %v480_v10 = vand.u32 2147483648, %v831_v44  ;;  %vm474_vm11 = vweird.f32 %v831_v44 }
 0x1b0   :  { %v618_v48 = vpop.eup %617  ;;  %623 = vrcp.f32 %v833_v45  ;;  %v837_v58 = vadd.f32 1.0, %v616_v46  ;;  %v493_v11 = vand.u32 2147483647, %v833_v45  ;;  %v495_v15 = vand.u32 2147483648, %v833_v45 }
 0x1b1   :  { %v620_v51 = vpop.eup %619  ;;  %v500_v52 = vmul.f32 %v618_v48, %v464_v34  ;;  %625 = vpow2.f32 %v593_v47  ;;  %vm505_vm4 = vweird.f32 %v618_v48  ;;  %vm479_vm13 = vcmp.eq.f32.partialorder %v478_v6, 8.507059e+37 }
 0x1b2   :  { %v515_v54 = vmul.f32 %v620_v51, %v465_v37  ;;  %627 = vpow2.f32 %v594_v50  ;;  %vm520_vm5 = vweird.f32 %v620_v51  ;;  %vm506_vm7 = vmor %vm504_vm1, %vm505_vm4  ;;  %v481_v27 = vor.u32 1.1754944e-38, %v480_v10 }
 0x1b3   :  { %v501_v56 = vsub.f32 1.0, %v500_v52  ;;  %629 = vrcp.f32 %v837_v58  ;;  %vm521_vm8 = vmor %vm519_vm3, %vm520_vm5  ;;  %vm489_vm14 = vweird.f32 %v833_v45  ;;  %v496_v30 = vor.u32 1.1754944e-38, %v495_v15 }
 0x1b4   :  { %v516_v60 = vsub.f32 1.0, %v515_v54  ;;  %vm494_vm0 = vcmp.eq.f32.partialorder %v493_v11, 8.507059e+37  ;;  %v570_v34 = vand.u32 2147483648, %v837_v58  ;;  %v568_v37 = vand.u32 2147483647, %v837_v58 }
 0x1b5   :  { %v622_v61 = vpop.eup %621  ;;  %v502_v62 = vmul.f32 %v618_v48, %v501_v56 }
 0x1b6   :  { %v624_v0 = vpop.eup %623  ;;  %v517_v1 = vmul.f32 %v620_v51, %v516_v60  ;;  %v470_v3 = vmul.f32 %v622_v61, %v831_v44  ;;  %vm475_vm9 = vweird.f32 %v622_v61  ;;  %v571_v40 = vor.u32 1.1754944e-38, %v570_v34 }
 0x1b7   :  { %v503_v4 = vadd.f32 %v618_v48, %v502_v62  ;;  %v485_v7 = vmul.f32 %v624_v0, %v833_v45  ;;  %v626_v12 = vpop.eup %625  ;;  %vm490_vm10 = vweird.f32 %v624_v0  ;;  %vm476_vm12 = vmor %vm474_vm11, %vm475_vm9  ;;  %vm569_vm4 = vcmp.eq.f32.partialorder %v568_v37, 8.507059e+37 }
 0x1b8   :  { %v518_v8 = vadd.f32 %v620_v51, %v517_v1  ;;  %v471_v9 = vsub.f32 1.0, %v470_v3  ;;  %v628_v16 = vpop.eup %627  ;;  %v466_v20 = vadd.f32 1.0, %v626_v12  ;;  %vm491_vm15 = vmor %vm489_vm14, %vm490_vm10 }
 0x1b9   :  { %v507_v13 = vsel %vm506_vm7, %v618_v48, %v503_v4  ;;  %v486_v14 = vsub.f32 1.0, %v485_v7  ;;  %v630_v21 = vpop.eup %629  ;;  %v467_v24 = vadd.f32 1.0, %v628_v16 }
 0x1ba   :  { %v512_v17 = vsel %vm839_vm2, %v511_v63, %v507_v13  ;;  %v522_v18 = vsel %vm521_vm8, %v620_v51, %v518_v8  ;;  %v472_v19 = vmul.f32 %v622_v61, %v471_v9  ;;  %v560_v26 = vmul.f32 %v630_v21, %v837_v58 }
 0x1bb   :  { %576 = vst [vmem:[%s895_s7 + $0x10] sm:$0xff] %v512_v17  ;;  %v527_v22 = vsel %vm844_vm6, %v526_v5, %v522_v18  ;;  %v487_v23 = vmul.f32 %v624_v0, %v486_v14  ;;  %631 = vrcp.f32 %v466_v20  ;;  %vm565_vm1 = vweird.f32 %v630_v21 }
 0x1bc   :  { %577 = vst [vmem:[%s895_s7 + $0x18] sm:$0xff] %v527_v22  ;;  %v473_v25 = vadd.f32 %v622_v61, %v472_v19  ;;  %v561_v31 = vsub.f32 1.0, %v560_v26  ;;  %633 = vrcp.f32 %v467_v24  ;;  %vm564_vm2 = vweird.f32 %v837_v58 }
 0x1bd   :  { %v488_v28 = vadd.f32 %v624_v0, %v487_v23  ;;  %vm566_vm3 = vmor %vm564_vm2, %vm565_vm1  ;;  %v540_v47 = vand.u32 2147483648, %v466_v20  ;;  %v538_v49 = vand.u32 2147483647, %v466_v20  ;;  %vm534_vm6 = vweird.f32 %v466_v20 }
 0x1be   :  { %v477_v29 = vsel %vm476_vm12, %v622_v61, %v473_v25  ;;  %v562_v36 = vmul.f32 %v630_v21, %v561_v31  ;;  %v555_v51 = vand.u32 2147483648, %v467_v24  ;;  %v553_v54 = vand.u32 2147483647, %v467_v24 }
 0x1bf   :  { %v482_v32 = vsel %vm479_vm13, %v481_v27, %v477_v29  ;;  %v492_v33 = vsel %vm491_vm15, %v624_v0, %v488_v28  ;;  %v541_v55 = vor.u32 1.1754944e-38, %v540_v47  ;;  %vm539_vm9 = vcmp.eq.f32.partialorder %v538_v49, 8.507059e+37 }
 0x1c0   :  { %574 = vst [vmem:[%s895_s7] sm:$0xff] %v482_v32  ;;  %v497_v35 = vsel %vm494_vm0, %v496_v30, %v492_v33  ;;  %v563_v39 = vadd.f32 %v630_v21, %v562_v36  ;;  %vm549_vm10 = vweird.f32 %v467_v24  ;;  %v556_v59 = vor.u32 1.1754944e-38, %v555_v51 }
 0x1c1   :  { %575 = vst [vmem:[%s895_s7 + $0x8] sm:$0xff] %v497_v35  ;;  %v632_v38 = vpop.eup %631  ;;  %vm554_vm12 = vcmp.eq.f32.partialorder %v553_v54, 8.507059e+37 }
 0x1c2   :  { %v530_v41 = vmul.f32 %v632_v38, %v466_v20  ;;  %v634_v42 = vpop.eup %633  ;;  %v567_v43 = vsel %vm566_vm3, %v630_v21, %v563_v39  ;;  %vm535_vm5 = vweird.f32 %v632_v38 }
 0x1c3   :  { %v572_v44 = vsel %vm569_vm4, %v571_v40, %v567_v43  ;;  %v545_v46 = vmul.f32 %v634_v42, %v467_v24  ;;  %vm550_vm7 = vweird.f32 %v634_v42  ;;  %vm536_vm8 = vmor %vm534_vm6, %vm535_vm5 }
 0x1c4   :  { %v531_v45 = vsub.f32 1.0, %v530_v41  ;;  %580 = vst [vmem:[%s895_s7 + $0x30] sm:$0xff] %v572_v44  ;;  %vm551_vm11 = vmor %vm549_vm10, %vm550_vm7 }
 0x1c5   :  { %v546_v50 = vsub.f32 1.0, %v545_v46 }
 0x1c6   :  { %v532_v48 = vmul.f32 %v632_v38, %v531_v45 }
 0x1c7   :  { %v547_v53 = vmul.f32 %v634_v42, %v546_v50 }
 0x1c8   :  { %v533_v52 = vadd.f32 %v632_v38, %v532_v48 }
 0x1c9   :  { %v548_v57 = vadd.f32 %v634_v42, %v547_v53 }
 0x1ca   :  { %v537_v56 = vsel %vm536_vm8, %v632_v38, %v533_v52 }
 0x1cb   :  { %v542_v58 = vsel %vm539_vm9, %v541_v55, %v537_v56  ;;  %v552_v60 = vsel %vm551_vm11, %v634_v42, %v548_v57 }
 0x1cc   :  { %578 = vst [vmem:[%s895_s7 + $0x20] sm:$0xff] %v542_v58  ;;  %v557_v61 = vsel %vm554_vm12, %v556_v59, %v552_v60 }
 0x1cd   :  { %579 = vst [vmem:[%s895_s7 + $0x28] sm:$0xff] %v557_v61 }
 0x1ce   :  { %585 = vsyncpa [#allocation3], 1 }
 0x1cf   :  { %586 = vsyncpa [#allocation5], 1 }
 0x1d0   :  { %587 = vsyncpa [#allocation8], 1 }

</bundles_post_ra>
